<compile_context>
chip_gen: v5e
topology: v5e:2x2
jax: 0.10.0
libtpu: 0.0.40
codegen_flags: <defaults>
</compile_context>

<pallas_src>
import functools

import numpy as np
import jax
import jax.numpy as jnp
from jax.experimental import pallas as pl
from jax.experimental.pallas import tpu as pltpu


# --------------------------------------------------------------------------- kernel
def margin_loss_kernel(trip_ref, hi_ref, lo_ref, out_ref, *, margin: float):
    """One triplet tile -> three partial sums (loss, pair_count, beta_sum).

    trip_ref : (tile_t, 8) f32   lanes = [a_idx, p_idx, n_idx, beta, mask, 0, 0, 0]
    hi_ref   : (B_pad, D_pad) bf16   high half of the f32 batch (resident, constant block)
    lo_ref   : (B_pad, D_pad) bf16   low  half (emb_f32 ~= hi + lo)
    out_ref  : (3, 1, 1, 1) f32      this tile's [sum(pos+neg), pair_count, sum(beta)]
    """
    trip = trip_ref[...]                                   # (tile_t, 8)
    a_idx = trip[:, 0:1].astype(jnp.int32)                 # (tile_t, 1)
    p_idx = trip[:, 1:2].astype(jnp.int32)
    n_idx = trip[:, 2:3].astype(jnp.int32)
    beta = trip[:, 3:4]
    mask = trip[:, 4:5]                                    # 1.0 real triplet / 0.0 padding

    tile_t = trip.shape[0]
    b_pad = hi_ref.shape[0]

    # {-1,0,+1} selector rows: (onehot_a - onehot_p) @ emb == (a - p), computed on the
    # otherwise idle MXU.  The selector is exact in bf16 (values are 0 / +-1).
    lane = jax.lax.broadcasted_iota(jnp.int32, (tile_t, b_pad), 1)
    oa = (lane == a_idx).astype(jnp.float32)
    op = (lane == p_idx).astype(jnp.float32)
    on = (lane == n_idx).astype(jnp.float32)
    sel_ap = (oa - op).astype(jnp.bfloat16)                # (tile_t, B_pad)
    sel_an = (oa - on).astype(jnp.bfloat16)

    hi = hi_ref[...]
    lo = lo_ref[...]
    # 2-term bf16 decomposition of the f32 batch: four single-pass bf16 matmuls total
    # (vs 3 x 6-pass HIGHEST matmuls in v2); error ~1e-5 relative, well inside tolerance.
    dap = (jnp.dot(sel_ap, hi, preferred_element_type=jnp.float32)
           + jnp.dot(sel_ap, lo, preferred_element_type=jnp.float32))   # (tile_t, D_pad)
    dan = (jnp.dot(sel_an, hi, preferred_element_type=jnp.float32)
           + jnp.dot(sel_an, lo, preferred_element_type=jnp.float32))

    # Same eps-before-sqrt semantics as the PyTorch reference.
    d_ap = jnp.sqrt(jnp.sum(dap * dap, axis=-1, keepdims=True) + 1e-8)  # (tile_t, 1)
    d_an = jnp.sqrt(jnp.sum(dan * dan, axis=-1, keepdims=True) + 1e-8)

    # mask applied BEFORE the >0 test so padding rows never count.
    pos_loss = jnp.maximum(d_ap - beta + margin, 0.0) * mask
    neg_loss = jnp.maximum(beta - d_an + margin, 0.0) * mask

    # TODO(synk): torch computes sum((pos>0) + (neg>0)) on bool tensors, which is a
    # logical OR in modern PyTorch; implemented as OR here (verify if the target repo
    # relies on old ByteTensor "count up to 2" semantics).
    counted = jnp.logical_or(pos_loss > 0.0, neg_loss > 0.0).astype(jnp.float32)

    out_ref[0, 0] = jnp.sum(pos_loss + neg_loss, axis=0, keepdims=True)   # (1, 1)
    out_ref[1, 0] = jnp.sum(counted, axis=0, keepdims=True)
    out_ref[2, 0] = jnp.sum(beta * mask, axis=0, keepdims=True)


# --------------------------------------------------------------------------- wrapper
@functools.partial(jax.jit, static_argnames=("margin", "nu", "tile_t"))
def margin_loss(trip, batch_hi, batch_lo, *, margin: float, nu: float, tile_t: int):
    """trip: (T_pad, 8) f32 packed metadata; batch_hi/lo: (B_pad, D_pad) bf16."""
    t_pad = trip.shape[0]
    b_pad, d_pad = batch_hi.shape
    assert t_pad % tile_t == 0
    num_tiles = t_pad // tile_t

    kernel = functools.partial(margin_loss_kernel, margin=float(margin))

    # Resident hi+lo (double buffered by the pipeline) + headroom; safe cap on v7x (64 MiB).
    vmem_limit = int(min(max(8 * b_pad * d_pad + (24 << 20), 32 << 20), 64 << 20))

    parts = pl.pallas_call(
        kernel,
        out_shape=jax.ShapeDtypeStruct((3, num_tiles, 1, 1), jnp.float32),
        grid_spec=pltpu.PrefetchScalarGridSpec(
            num_scalar_prefetch=0,
            grid=(num_tiles,),
            in_specs=[
                pl.BlockSpec((tile_t, 8), lambda i: (i, 0)),       # packed triplet data
                pl.BlockSpec((b_pad, d_pad), lambda i: (0, 0)),    # batch hi (resident)
                pl.BlockSpec((b_pad, d_pad), lambda i: (0, 0)),    # batch lo (resident)
            ],
            out_specs=pl.BlockSpec((3, 1, 1, 1), lambda i: (0, i, 0, 0)),
        ),
        compiler_params=pltpu.CompilerParams(
            dimension_semantics=("parallel",),          # both TensorCores on v7x
            vmem_limit_bytes=vmem_limit),
    )(trip, batch_hi, batch_lo)

    sums = jnp.sum(parts, axis=(1, 2, 3))               # (3,): [loss, count, beta_sum]
    total, count, beta_sum = sums[0], sums[1], sums[2]
    # Guard the divide (count==0 branch still selects `total`, but avoid a latent 0/0).
    loss = jnp.where(count == 0.0, total, total / jnp.maximum(count, 1.0))
    if nu:
        # TODO(synk): original PyTorch has a typo (beta_regularisation_loss -> NameError);
        # implemented as intended: nu * sum(per-triplet beta).
        loss = loss + nu * beta_sum
    return loss


# --------------------------------------------------------------------------- "module"
class MarginCriterion:
    """JAX/Pallas re-implementation of criteria/margin.py::Criterion (forward only)."""

    def __init__(self, num_classes, batchminer, *, margin=0.2, nu=0.0,
                 beta_constant=False, beta=1.2):
        self.n_classes = num_classes
        self.margin = margin
        self.nu = nu
        self.beta_constant = beta_constant
        self.beta_val = beta
        if beta_constant:
            self.beta = beta                                     # python scalar
        else:
            # deterministic "parameter": ones(num_classes + 1) * beta
            self.beta = jnp.ones((num_classes + 1,), jnp.float32) * beta
        self.batchminer = batchminer
        self.name = "margin"

    def __call__(self, batch, labels, step=0, **kwargs):
        batch = jnp.asarray(batch, jnp.float32)
        labels_np = np.asarray(labels)

        # Only copy the full batch device->host if the miner actually needs embeddings
        # (ours only needs labels) -- avoids a blocking full-batch D2H every step.
        if getattr(self.batchminer, "requires_embeddings", False):
            miner_batch = np.asarray(batch)
        else:
            miner_batch = None
        sampled_triplets = self.batchminer(miner_batch, labels_np)
        if len(sampled_triplets) == 0:
            return jnp.asarray(0.0, jnp.float32)

        trip_idx = np.asarray(sampled_triplets, dtype=np.int64)  # (T, 3): anchor, pos, neg
        T = trip_idx.shape[0]
        B, D = batch.shape

        # Triplet tiling: whole thing in one tile if small, else 256-row tiles.
        # TODO(synk): raise the cap to 512 on v6e (128 MiB VMEM) when B_pad*D_pad allows.
        if T <= 256:
            tile_t = max(8, ((T + 7) // 8) * 8)
        else:
            tile_t = 256
        t_pad = pl.cdiv(T, tile_t) * tile_t

        # One packed (T_pad, 8) metadata array: [a, p, n, beta, mask, 0, 0, 0] per row.
        # Padding rows point at row 0 with mask 0 -> never counted.
        trip_np = np.zeros((t_pad, 8), np.float32)
        trip_np[:T, 0] = trip_idx[:, 0]
        trip_np[:T, 1] = trip_idx[:, 1]
        trip_np[:T, 2] = trip_idx[:, 2]
        trip_np[:T, 4] = 1.0
        if self.beta_constant:
            trip_np[:T, 3] = self.beta_val
            trip_dev = jnp.asarray(trip_np)
        else:
            trip_dev = jnp.asarray(trip_np)
            anchor_labels = jnp.asarray(labels_np[trip_idx[:, 0]].astype(np.int32))
            trip_dev = trip_dev.at[:T, 3].set(self.beta[anchor_labels])

        # Pad the batch once to 128-aligned shapes (rows = selector lane dim, cols = D).
        b_pad = ((B + 127) // 128) * 128
        d_pad = ((D + 127) // 128) * 128
        if (b_pad, d_pad) != (B, D):
            batch_p = jnp.zeros((b_pad, d_pad), jnp.float32).at[:B, :D].set(batch)
        else:
            batch_p = batch

        # bf16 hi/lo split (done once, on device): exact-enough f32 reconstruction with
        # single-pass bf16 MXU matmuls inside the kernel; same bytes as one f32 copy.
        batch_hi = batch_p.astype(jnp.bfloat16)
        batch_lo = (batch_p - batch_hi.astype(jnp.float32)).astype(jnp.bfloat16)

        return margin_loss(trip_dev, batch_hi, batch_lo,
                           margin=float(self.margin), nu=float(self.nu), tile_t=tile_t)


# --------------------------------------------------------------------------- miner (glue)
def deterministic_triplet_miner(batch_np, labels_np):
    """Vectorized deterministic miner (host-side index computation only; ignores batch).

    For each anchor i: positive = cyclically-next sample of the same class,
                       negative = cyclically-next sample of a different class.
    """
    labels = np.asarray(labels_np).reshape(-1)
    n = labels.shape[0]
    if n == 0:
        return []
    same = labels[None, :] == labels[:, None]
    np.fill_diagonal(same, False)
    diff = labels[None, :] != labels[:, None]
    valid = same.any(axis=1) & diff.any(axis=1)
    col = np.arange(n)
    dist = (col[None, :] - np.arange(n)[:, None]) % n            # cyclic distance i -> j
    pos = np.argmin(np.where(same, dist, n), axis=1)
    neg = np.argmin(np.where(diff, dist, n), axis=1)
    anchors = np.nonzero(valid)[0]
    return [(int(i), int(pos[i]), int(neg[i])) for i in anchors]


deterministic_triplet_miner.requires_embeddings = False   # labels-only miner -> no D2H batch copy


# --------------------------------------------------------------------------- reference
def _reference_loss(batch_np, labels_np, triplets, beta_param, margin, nu,
                    beta_constant, beta_val):
    trip = np.asarray(triplets, dtype=np.int64)
    x = np.asarray(batch_np, np.float64)
    a, p, n = x[trip[:, 0]], x[trip[:, 1]], x[trip[:, 2]]
    d_ap = np.sqrt(((a - p) ** 2).sum(-1) + 1e-8)
    d_an = np.sqrt(((a - n) ** 2).sum(-1) + 1e-8)
    if beta_constant:
        beta = np.full((trip.shape[0],), beta_val, np.float64)
    else:
        beta = np.asarray(beta_param, np.float64)[np.asarray(labels_np)[trip[:, 0]]]
    pos = np.maximum(d_ap - beta + margin, 0.0)
    neg = np.maximum(beta - d_an + margin, 0.0)
    cnt = float(np.sum((pos > 0) | (neg > 0)))
    loss = float(np.sum(pos + neg))
    if cnt > 0:
        loss = loss / cnt
    if nu:
        loss = loss + nu * float(np.sum(beta))
    return loss


# --------------------------------------------------------------------------- main
if __name__ == "__main__":
    key = jax.random.PRNGKey(0)
    k1, k2 = jax.random.split(key)

    # ---- test 1: tiny batch, single grid step, nu = 0, learned (per-class) beta ----
    B1, D1, C1 = 8, 128, 4
    batch1 = jax.random.normal(k1, (B1, D1), jnp.float32)
    batch1 = batch1 / jnp.linalg.norm(batch1, axis=-1, keepdims=True)
    labels1 = jnp.array([0, 0, 1, 1, 2, 2, 3, 3], dtype=jnp.int32)

    crit1 = MarginCriterion(C1, deterministic_triplet_miner,
                            margin=0.2, nu=0.0, beta_constant=False, beta=1.2)
    loss1 = crit1(batch1, labels1, step=0)
    jax.block_until_ready(loss1)

    trip1 = deterministic_triplet_miner(None, np.asarray(labels1))
    ref1 = _reference_loss(np.asarray(batch1), np.asarray(labels1), trip1,
                           np.asarray(crit1.beta), 0.2, 0.0, False, 1.2)
    assert abs(float(loss1) - ref1) <= 2e-3 * max(1.0, abs(ref1)), (float(loss1), ref1)

    # ---- test 2: larger batch -> 2-step grid, padded B & D, constant beta, nu != 0 ----
    B2, D2, C2 = 300, 96, 10
    batch2 = jax.random.normal(k2, (B2, D2), jnp.float32)
    batch2 = batch2 / jnp.linalg.norm(batch2, axis=-1, keepdims=True)
    labels2 = jnp.asarray(np.arange(B2) % C2, dtype=jnp.int32)

    crit2 = MarginCriterion(C2, deterministic_triplet_miner,
                            margin=0.2, nu=0.01, beta_constant=True, beta=1.2)
    loss2 = crit2(batch2, labels2, step=0)
    jax.block_until_ready(loss2)

    trip2 = deterministic_triplet_miner(None, np.asarray(labels2))
    ref2 = _reference_loss(np.asarray(batch2), np.asarray(labels2), trip2, None,
                           0.2, 0.01, True, 1.2)
    assert abs(float(loss2) - ref2) <= 2e-3 * max(1.0, abs(ref2)), (float(loss2), ref2)

    print("KERNEL_OK")
</pallas_src>

<mosaic_0001>
module attributes {stable_mosaic.version = 11 : i64} {
  func.func @margin_loss_kernel(%arg0: i32, %arg1: memref<8x8xf32, #tpu.memory_space<vmem>>, %arg2: memref<128x128xbf16, #tpu.memory_space<vmem>>, %arg3: memref<128x128xbf16, #tpu.memory_space<vmem>>, %arg4: memref<3x1x1x1xf32, #tpu.memory_space<vmem>>) attributes {dimension_semantics = [#tpu.dimension_semantics<parallel>], iteration_bounds = array<i64: 1>, scalar_prefetch = 0 : i64, scratch_operands = 0 : i64, tpu.core_type = #tpu.core_type<tc>, window_params = [{transform_indices = @transform_0, window_bounds = array<i64: 8, 8>}, {pipeline_mode = #tpu.pipeline_mode<synchronous>, transform_indices = @transform_1, window_bounds = array<i64: 128, 128>}, {pipeline_mode = #tpu.pipeline_mode<synchronous>, transform_indices = @transform_2, window_bounds = array<i64: 128, 128>}, {transform_indices = @transform_3, window_bounds = array<i64: 3, 1, 1, 1>}]} {
    %c0 = arith.constant 0 : index
    %c0_0 = arith.constant 0 : index
    %0 = vector.load %arg1[%c0, %c0_0] : memref<8x8xf32, #tpu.memory_space<vmem>>, vector<8x8xf32>
    %1 = vector.extract_strided_slice %0 {offsets = [0, 0], sizes = [8, 1], strides = [1, 1]} : vector<8x8xf32> to vector<8x1xf32>
    %2 = arith.fptosi %1 : vector<8x1xf32> to vector<8x1xi32>
    %3 = vector.extract_strided_slice %0 {offsets = [0, 1], sizes = [8, 1], strides = [1, 1]} : vector<8x8xf32> to vector<8x1xf32>
    %4 = arith.fptosi %3 : vector<8x1xf32> to vector<8x1xi32>
    %5 = vector.extract_strided_slice %0 {offsets = [0, 2], sizes = [8, 1], strides = [1, 1]} : vector<8x8xf32> to vector<8x1xf32>
    %6 = arith.fptosi %5 : vector<8x1xf32> to vector<8x1xi32>
    %7 = vector.extract_strided_slice %0 {offsets = [0, 3], sizes = [8, 1], strides = [1, 1]} : vector<8x8xf32> to vector<8x1xf32>
    %8 = vector.extract_strided_slice %0 {offsets = [0, 4], sizes = [8, 1], strides = [1, 1]} : vector<8x8xf32> to vector<8x1xf32>
    %9 = tpu.iota {dimensions = array<i32: 1>} : vector<8x128xi32>
    %10 = vector.broadcast %2 : vector<8x1xi32> to vector<8x128xi32>
    %11 = arith.cmpi eq, %9, %10 : vector<8x128xi32>
    %12 = arith.extui %11 : vector<8x128xi1> to vector<8x128xi32>
    %13 = arith.sitofp %12 : vector<8x128xi32> to vector<8x128xf32>
    %14 = vector.broadcast %4 : vector<8x1xi32> to vector<8x128xi32>
    %15 = arith.cmpi eq, %9, %14 : vector<8x128xi32>
    %16 = arith.extui %15 : vector<8x128xi1> to vector<8x128xi32>
    %17 = arith.sitofp %16 : vector<8x128xi32> to vector<8x128xf32>
    %18 = vector.broadcast %6 : vector<8x1xi32> to vector<8x128xi32>
    %19 = arith.cmpi eq, %9, %18 : vector<8x128xi32>
    %20 = arith.extui %19 : vector<8x128xi1> to vector<8x128xi32>
    %21 = arith.sitofp %20 : vector<8x128xi32> to vector<8x128xf32>
    %22 = arith.subf %13, %17 : vector<8x128xf32>
    %23 = arith.truncf %22 : vector<8x128xf32> to vector<8x128xbf16>
    %24 = arith.subf %13, %21 : vector<8x128xf32>
    %25 = arith.truncf %24 : vector<8x128xf32> to vector<8x128xbf16>
    %c0_1 = arith.constant 0 : index
    %c0_2 = arith.constant 0 : index
    %26 = vector.load %arg2[%c0_1, %c0_2] : memref<128x128xbf16, #tpu.memory_space<vmem>>, vector<128x128xbf16>
    %c0_3 = arith.constant 0 : index
    %c0_4 = arith.constant 0 : index
    %27 = vector.load %arg3[%c0_3, %c0_4] : memref<128x128xbf16, #tpu.memory_space<vmem>>, vector<128x128xbf16>
    %cst = arith.constant dense<0.000000e+00> : vector<8x128xf32>
    %28 = tpu.matmul %23, %26, %cst {dimension_numbers = #tpu.dot_dimension_numbers<[1], [0], [0], [1], [0, 0, 1, 1], [], []>} : vector<8x128xbf16>, vector<128x128xbf16>, vector<8x128xf32> -> vector<8x128xf32>
    %cst_5 = arith.constant dense<0.000000e+00> : vector<8x128xf32>
    %29 = tpu.matmul %23, %27, %cst_5 {dimension_numbers = #tpu.dot_dimension_numbers<[1], [0], [0], [1], [0, 0, 1, 1], [], []>} : vector<8x128xbf16>, vector<128x128xbf16>, vector<8x128xf32> -> vector<8x128xf32>
    %30 = arith.addf %28, %29 : vector<8x128xf32>
    %cst_6 = arith.constant dense<0.000000e+00> : vector<8x128xf32>
    %31 = tpu.matmul %25, %26, %cst_6 {dimension_numbers = #tpu.dot_dimension_numbers<[1], [0], [0], [1], [0, 0, 1, 1], [], []>} : vector<8x128xbf16>, vector<128x128xbf16>, vector<8x128xf32> -> vector<8x128xf32>
    %cst_7 = arith.constant dense<0.000000e+00> : vector<8x128xf32>
    %32 = tpu.matmul %25, %27, %cst_7 {dimension_numbers = #tpu.dot_dimension_numbers<[1], [0], [0], [1], [0, 0, 1, 1], [], []>} : vector<8x128xbf16>, vector<128x128xbf16>, vector<8x128xf32> -> vector<8x128xf32>
    %33 = arith.addf %31, %32 : vector<8x128xf32>
    %34 = arith.mulf %30, %30 : vector<8x128xf32>
    %cst_8 = arith.constant dense<0.000000e+00> : vector<8xf32>
    %35 = vector.multi_reduction <add>, %34, %cst_8 [1] : vector<8x128xf32> to vector<8xf32>
    %36 = vector.shape_cast %35 : vector<8xf32> to vector<8x1xf32>
    %cst_9 = arith.constant 9.99999993E-9 : f32
    %37 = vector.broadcast %cst_9 : f32 to vector<8x1xf32>
    %38 = arith.addf %36, %37 : vector<8x1xf32>
    %39 = math.sqrt %38 : vector<8x1xf32>
    %40 = arith.mulf %33, %33 : vector<8x128xf32>
    %cst_10 = arith.constant dense<0.000000e+00> : vector<8xf32>
    %41 = vector.multi_reduction <add>, %40, %cst_10 [1] : vector<8x128xf32> to vector<8xf32>
    %42 = vector.shape_cast %41 : vector<8xf32> to vector<8x1xf32>
    %cst_11 = arith.constant 9.99999993E-9 : f32
    %43 = vector.broadcast %cst_11 : f32 to vector<8x1xf32>
    %44 = arith.addf %42, %43 : vector<8x1xf32>
    %45 = math.sqrt %44 : vector<8x1xf32>
    %46 = arith.subf %39, %7 : vector<8x1xf32>
    %cst_12 = arith.constant 2.000000e-01 : f32
    %47 = vector.broadcast %cst_12 : f32 to vector<8x1xf32>
    %48 = arith.addf %46, %47 : vector<8x1xf32>
    %cst_13 = arith.constant 0.000000e+00 : f32
    %49 = vector.broadcast %cst_13 : f32 to vector<8x1xf32>
    %50 = arith.maximumf %48, %49 : vector<8x1xf32>
    %51 = arith.mulf %50, %8 : vector<8x1xf32>
    %52 = arith.subf %7, %45 : vector<8x1xf32>
    %cst_14 = arith.constant 2.000000e-01 : f32
    %53 = vector.broadcast %cst_14 : f32 to vector<8x1xf32>
    %54 = arith.addf %52, %53 : vector<8x1xf32>
    %cst_15 = arith.constant 0.000000e+00 : f32
    %55 = vector.broadcast %cst_15 : f32 to vector<8x1xf32>
    %56 = arith.maximumf %54, %55 : vector<8x1xf32>
    %57 = arith.mulf %56, %8 : vector<8x1xf32>
    %cst_16 = arith.constant 0.000000e+00 : f32
    %58 = vector.broadcast %cst_16 : f32 to vector<8x1xf32>
    %59 = arith.cmpf ogt, %51, %58 : vector<8x1xf32>
    %cst_17 = arith.constant 0.000000e+00 : f32
    %60 = vector.broadcast %cst_17 : f32 to vector<8x1xf32>
    %61 = arith.cmpf ogt, %57, %60 : vector<8x1xf32>
    %62 = arith.ori %59, %61 : vector<8x1xi1>
    %63 = arith.extui %62 : vector<8x1xi1> to vector<8x1xi32>
    %64 = arith.sitofp %63 : vector<8x1xi32> to vector<8x1xf32>
    %65 = arith.addf %51, %57 : vector<8x1xf32>
    %cst_18 = arith.constant dense<0.000000e+00> : vector<1xf32>
    %66 = vector.multi_reduction <add>, %65, %cst_18 [0] : vector<8x1xf32> to vector<1xf32>
    %67 = vector.shape_cast %66 : vector<1xf32> to vector<1x1xf32>
    %c0_19 = arith.constant 0 : index
    %c0_20 = arith.constant 0 : index
    %c0_21 = arith.constant 0 : index
    %c0_22 = arith.constant 0 : index
    %68 = vector.load %arg4[%c0_19, %c0_20, %c0_21, %c0_22] : memref<3x1x1x1xf32, #tpu.memory_space<vmem>>, vector<1x1x1x1xf32>
    %69 = vector.shape_cast %68 : vector<1x1x1x1xf32> to vector<1x1xf32>
    %70 = vector.shape_cast %67 : vector<1x1xf32> to vector<1x1x1x1xf32>
    tpu.vector_store %arg4[%c0_19, %c0_20, %c0_21, %c0_22], %70 {strides = array<i32>} : memref<3x1x1x1xf32, #tpu.memory_space<vmem>>, vector<1x1x1x1xf32>,
    %cst_23 = arith.constant dense<0.000000e+00> : vector<1xf32>
    %71 = vector.multi_reduction <add>, %64, %cst_23 [0] : vector<8x1xf32> to vector<1xf32>
    %72 = vector.shape_cast %71 : vector<1xf32> to vector<1x1xf32>
    %c1 = arith.constant 1 : index
    %c0_24 = arith.constant 0 : index
    %c0_25 = arith.constant 0 : index
    %c0_26 = arith.constant 0 : index
    %73 = vector.load %arg4[%c1, %c0_24, %c0_25, %c0_26] : memref<3x1x1x1xf32, #tpu.memory_space<vmem>>, vector<1x1x1x1xf32>
    %74 = vector.shape_cast %73 : vector<1x1x1x1xf32> to vector<1x1xf32>
    %75 = vector.shape_cast %72 : vector<1x1xf32> to vector<1x1x1x1xf32>
    tpu.vector_store %arg4[%c1, %c0_24, %c0_25, %c0_26], %75 {strides = array<i32>} : memref<3x1x1x1xf32, #tpu.memory_space<vmem>>, vector<1x1x1x1xf32>,
    %76 = arith.mulf %7, %8 : vector<8x1xf32>
    %cst_27 = arith.constant dense<0.000000e+00> : vector<1xf32>
    %77 = vector.multi_reduction <add>, %76, %cst_27 [0] : vector<8x1xf32> to vector<1xf32>
    %78 = vector.shape_cast %77 : vector<1xf32> to vector<1x1xf32>
    %c2 = arith.constant 2 : index
    %c0_28 = arith.constant 0 : index
    %c0_29 = arith.constant 0 : index
    %c0_30 = arith.constant 0 : index
    %79 = vector.load %arg4[%c2, %c0_28, %c0_29, %c0_30] : memref<3x1x1x1xf32, #tpu.memory_space<vmem>>, vector<1x1x1x1xf32>
    %80 = vector.shape_cast %79 : vector<1x1x1x1xf32> to vector<1x1xf32>
    %81 = vector.shape_cast %78 : vector<1x1xf32> to vector<1x1x1x1xf32>
    tpu.vector_store %arg4[%c2, %c0_28, %c0_29, %c0_30], %81 {strides = array<i32>} : memref<3x1x1x1xf32, #tpu.memory_space<vmem>>, vector<1x1x1x1xf32>,
    return
  }
  func.func @transform_0(%arg0: i32) -> (i32, i32) {
    %c0_i32 = arith.constant 0 : i32
    %c0_i32_0 = arith.constant 0 : i32
    return %arg0, %c0_i32 : i32, i32
  }
  func.func @transform_1(%arg0: i32) -> (i32, i32) {
    %c0_i32 = arith.constant 0 : i32
    %c0_i32_0 = arith.constant 0 : i32
    %c0_i32_1 = arith.constant 0 : i32
    return %c0_i32, %c0_i32_0 : i32, i32
  }
  func.func @transform_2(%arg0: i32) -> (i32, i32) {
    %c0_i32 = arith.constant 0 : i32
    %c0_i32_0 = arith.constant 0 : i32
    %c0_i32_1 = arith.constant 0 : i32
    return %c0_i32, %c0_i32_0 : i32, i32
  }
  func.func @transform_3(%arg0: i32) -> (i32, i32, i32, i32) {
    %c0_i32 = arith.constant 0 : i32
    %c0_i32_0 = arith.constant 0 : i32
    %c0_i32_1 = arith.constant 0 : i32
    %c0_i32_2 = arith.constant 0 : i32
    return %c0_i32, %arg0, %c0_i32_0, %c0_i32_1 : i32, i32, i32, i32
  }
}

</mosaic_0001>

<bundles_post_ra>
// kernel: margin_loss.1
= control target key start
LH: loop header
LB: loop body
LE: loop exit
PB: predicated region body
PF: predicated region fallthrough
CT: control target
= control target key end

     0   :  { %8 = vsyncpa [#allocation3], 0  ;;  %s612_s0 = inlined_call_operand.hbm [shape: f32[8,8], index: 0, kind: input, shape index: {}]   ;;  %s613_s1 = inlined_call_operand.hbm [shape: bf16[128,128], index: 1, kind: input, shape index: {}]   ;;  %s614_s2 = inlined_call_operand.hbm [shape: bf16[128,128], index: 2, kind: input, shape index: {}]   ;;  %s615_s3 = inlined_call_operand.vmem [shape: f32[3,1,1,1], index: 3, kind: output, shape index: {}]  }
   0x1   :  { %9 = vsyncpa [#allocation5], 0  ;;  %s25_s14 = sshll.u32 %s613_s1, 4  ;;  %s547_s15 = smov [#allocation4]   ;;  %s26_s14 = int_to_ptr.hbm [resolvable:$true] %s25_s14 }
   0x2   :  { %s27_s16 = sshll.u32 %s547_s15, 4  ;;  %s15_s19 = sshll.u32 %s612_s0, 4  ;;  %s28_s16 = int_to_ptr.vmem [resolvable:$true] %s27_s16  ;;  %s16_s19 = int_to_ptr.hbm [resolvable:$true] %s15_s19 }
   0x3   :  { %s548_s20 = smov 64   ;;  %s549_s21 = smov 4  }
   0x4   :  { %33 = dma.hbm_to_vmem [thread:$0]  %s26_s14, 1024, %s28_s16, [#allocation5], %s548_s20, %s548_s20, %s549_s21  }
   0x5   :  { %s550_s22 = smov [#allocation2]   ;;  %s38_s26 = sshll.u32 %s614_s2, 4  ;;  %s39_s26 = int_to_ptr.hbm [resolvable:$true] %s38_s26 }
   0x6   :  { %s17_s23 = sshll.u32 %s550_s22, 4  ;;  %s551_s1 = smov [#allocation6]   ;;  %s18_s23 = int_to_ptr.vmem [resolvable:$true] %s17_s23 }
   0x7   :  { %20 = dma.hbm_to_vmem [thread:$0]  %s16_s19, 128, %s18_s23, [#allocation3]  }
   0x8   :  { %s40_s27 = sshll.u32 %s551_s1, 4  ;;  %s41_s27 = int_to_ptr.vmem [resolvable:$true] %s40_s27 }
   0x9   :  { %46 = dma.hbm_to_vmem [thread:$0]  %s39_s26, 1024, %s41_s27, [#allocation5], %s548_s20, %s548_s20, %s549_s21  }
   0xa   :  { %543 = dma.done.wait [#allocation3], 128  }
   0xb   :  { %544 = vsyncadd [#allocation3], 4294967168 }
   0xc   :  { %545 = dma.done.wait [#allocation5], 2048  }
   0xd   :  { %546 = vsyncadd [#allocation5], 4294965248  ;;  %v552_v0 = vmov 1   ;;  %v553_v1 = vmov 0   ;;  %v587_v2 = vld [vmem:[#allocation2] sm:$0xff]  ;;  %v446_v8 = vld [vmem:[#allocation6 + $0x30] sm:$0xff]  ;;  %v61_v24 = vlaneseq }
   0xe   :  { %466 = vset.pattern.permute.xlu1 %v552_v0  ;;  %464 = vset.pattern.permute.xlu0 %v553_v1  ;;  %v447_v3 = vld [vmem:[#allocation6 + $0x38] sm:$0xff]  ;;  %vm448_vm0 = vcmp.lt.s32.totalorder %v587_v2, 0  ;;  %v449_v5 = vceil.f32 %v587_v2  ;;  %v450_v6 = vfloor.f32 %v587_v2  ;;  %v438_v9 = vld [vmem:[#allocation4 + $0x30] sm:$0xff]  ;;  %v445_v11 = vld [vmem:[#allocation6 + $0x28] sm:$0xff]  ;;  %v554_v15 = vmov 2   ;;  %s556_s0 = smov 127  }
   0xf   :  { %v439_v4 = vld [vmem:[#allocation4 + $0x38] sm:$0xff]  ;;  %165 = vmatpush.bf16.msra.mxu0 %v447_v3  ;;  %239 = vmatpush.bf16.msra.mxu2 %v447_v3  ;;  %v437_v12 = vld [vmem:[#allocation4 + $0x28] sm:$0xff]  ;;  %v444_v13 = vld [vmem:[#allocation6 + $0x20] sm:$0xff]  ;;  %v62_v25 = vand.u32 127, %v61_v24  ;;  %v555_v28 = vmov 0.0   ;;  %vm315_vm4 = vcmask 31768  }
  0x10   :  { %226 = vmatpush.bf16.msra.mxu1 %v439_v4  ;;  %v451_v7 = vsel %vm448_vm0, %v449_v5, %v450_v6  ;;  %252 = vmatpush.bf16.msra.mxu3 %v439_v4  ;;  %v436_v14 = vld [vmem:[#allocation4 + $0x20] sm:$0xff]  ;;  %v443_v16 = vld [vmem:[#allocation6 + $0x18] sm:$0xff]  ;;  %v442_v18 = vld [vmem:[#allocation6 + $0x10] sm:$0xff]  ;;  %s557_s2 = smov 125   ;;  %vm327_vm12 = vcmask 0  }
  0x11   :  { %v452_v10 = vcvt.f32.s32 %v451_v7  ;;  %v435_v17 = vld [vmem:[#allocation4 + $0x18] sm:$0xff]  ;;  %v434_v19 = vld [vmem:[#allocation4 + $0x10] sm:$0xff]  ;;  %v441_v20 = vld [vmem:[#allocation6 + $0x8] sm:$0xff] }
  0x12   :  { %v433_v21 = vld [vmem:[#allocation4 + $0x8] sm:$0xff]  ;;  %v440_v22 = vld [vmem:[#allocation6] sm:$0xff] }
  0x13   :  { %70 = vperm.xlu1 %466, %v452_v10   ;;  %64 = vperm.xlu0 %464, %v452_v10   ;;  %v432_v23 = vld [vmem:[#allocation4] sm:$0xff] }
  0x14   :  { %166 = vmatpush.bf16.msra.mxu0 %v446_v8  ;;  %227 = vmatpush.bf16.msra.mxu1 %v438_v9 }
  0x15   :  { %240 = vmatpush.bf16.msra.mxu2 %v446_v8  ;;  %253 = vmatpush.bf16.msra.mxu3 %v438_v9 }
  0x18   :  { %167 = vmatpush.bf16.msra.mxu0 %v445_v11  ;;  %228 = vmatpush.bf16.msra.mxu1 %v437_v12 }
  0x19   :  { %241 = vmatpush.bf16.msra.mxu2 %v445_v11  ;;  %254 = vmatpush.bf16.msra.mxu3 %v437_v12 }
  0x1b   :  { %465 = vset.pattern.permute.xlu0 %v554_v15 }
  0x1c   :  { %76 = vperm.xlu0 %465, %v452_v10   ;;  %168 = vmatpush.bf16.msra.mxu0 %v444_v13 }
  0x1d   :  { %229 = vmatpush.bf16.msra.mxu1 %v436_v14  ;;  %242 = vmatpush.bf16.msra.mxu2 %v444_v13 }
  0x1e   :  { %255 = vmatpush.bf16.msra.mxu3 %v436_v14 }
  0x20   :  { %169 = vmatpush.bf16.msra.mxu0 %v443_v16 }
  0x21   :  { %230 = vmatpush.bf16.msra.mxu1 %v435_v17  ;;  %243 = vmatpush.bf16.msra.mxu2 %v443_v16 }
  0x22   :  { %256 = vmatpush.bf16.msra.mxu3 %v435_v17 }
  0x24   :  { %170 = vmatpush.bf16.msra.mxu0 %v442_v18 }
  0x25   :  { %231 = vmatpush.bf16.msra.mxu1 %v434_v19  ;;  %244 = vmatpush.bf16.msra.mxu2 %v442_v18 }
  0x26   :  { %257 = vmatpush.bf16.msra.mxu3 %v434_v19 }
  0x28   :  { %171 = vmatpush.bf16.msra.mxu0 %v441_v20 }
  0x29   :  { %232 = vmatpush.bf16.msra.mxu1 %v433_v21  ;;  %245 = vmatpush.bf16.msra.mxu2 %v441_v20 }
  0x2a   :  { %258 = vmatpush.bf16.msra.mxu3 %v433_v21 }
  0x2c   :  { %172 = vmatpush.bf16.msra.mxu0 %v440_v22 }
  0x2d   :  { %233 = vmatpush.bf16.msra.mxu1 %v432_v23  ;;  %246 = vmatpush.bf16.msra.mxu2 %v440_v22 }
  0x2e   :  { %259 = vmatpush.bf16.msra.mxu3 %v432_v23 }
  0x85   :  { %v71_v26 = vpop.permute.xlu1 %70  ;;  %v65_v27 = vpop.permute.xlu0 %64 }
  0x86   :  { %vm72_vm1 = vcmp.eq.s32.totalorder %v62_v25, %v71_v26  ;;  %vm66_vm2 = vcmp.eq.s32.totalorder %v62_v25, %v65_v27 }
  0x87   :  { %v363_v29 = vsel %vm72_vm1, 1.0, %v555_v28  ;;  %v362_v30 = vsel %vm66_vm2, 1.0, %v555_v28 }
  0x88   :  { %v81_v31 = vsub.f32 %v362_v30, %v363_v29 }
  0x8a   :  { %v82_v32 = vpack.c.bf16 %v81_v31, %v81_v31 }
  0x8c   :  { %173 = vmatmul.bf16.vlgmr.msra.gmra.mxu0 %v82_v32  ;;  %234 = vmatmul.bf16.vlgmr.msra.gmra.mxu1 %v82_v32 }
  0x8e   :  { %v77_v33 = vpop.permute.xlu0 %76 }
  0x8f   :  { %vm78_vm3 = vcmp.eq.s32.totalorder %v62_v25, %v77_v33 }
  0x90   :  { %v364_v34 = vsel %vm78_vm3, 1.0, %v555_v28 }
  0x91   :  { %v83_v35 = vsub.f32 %v362_v30, %v364_v34 }
  0x93   :  { %v84_v36 = vpack.c.bf16 %v83_v35, %v83_v35 }
  0x95   :  { %247 = vmatmul.bf16.vlgmr.msra.gmra.mxu2 %v84_v36  ;;  %260 = vmatmul.bf16.vlgmr.msra.gmra.mxu3 %v84_v36 }
 0x109   :  { %v174_v37 = vpop.f32.mrf.mxu0  ;;  %v235_v38 = vpop.f32.mrf.mxu1 }
 0x10a   :  { %v236_v39 = vadd.f32 %v235_v38, %v174_v37 }
 0x10c   :  { %v265_v40 = vmul.f32 %v236_v39, %v236_v39 }
 0x10e   :  { %266 = vadd.xlane.f32.xlu1 %v265_v40 }
 0x111   :  { %v176_v41 = vpop.f32.mrf.mxu0  ;;  %v237_v42 = vpop.f32.mrf.mxu1 }
 0x118   :  { %v248_v43 = vpop.f32.mrf.mxu2  ;;  %v261_v44 = vpop.f32.mrf.mxu3 }
 0x119   :  { %v262_v45 = vadd.f32 %v261_v44, %v248_v43 }
 0x11b   :  { %v281_v46 = vmul.f32 %v262_v45, %v262_v45 }
 0x11d   :  { %282 = vadd.xlane.f32.xlu2 %v281_v46 }
 0x120   :  { %v250_v47 = vpop.f32.mrf.mxu2  ;;  %v263_v48 = vpop.f32.mrf.mxu3 }
 0x135   :  { %301 = vrot.lane.b32.xlu2 %v587_v2, %s556_s0 }
 0x181   :  { %v267_v49 = vpop.xlane.xlu1 %266 }
 0x182   :  { %v268_v50 = vadd.f32 1e-08, %v267_v49 }
 0x184   :  { %467 = vrsqrt.f32 %v268_v50  ;;  %vm276_vm5 = vcmp.eq.f32.partialorder %v268_v50, inf  ;;  %v279_v1 = vand.u32 2147483648, %v268_v50  ;;  %vm278_vm6 = vcmp.eq.f32.partialorder %v268_v50, 0.0 }
 0x18a   :  { %v468_v51 = vpop.eup %467 }
 0x18b   :  { %v270_v52 = vmul.f32 %v468_v51, %v268_v50 }
 0x18d   :  { %v271_v53 = vmul.f32 %v468_v51, %v270_v52 }
 0x18f   :  { %v272_v54 = vmul.f32 0.5, %v271_v53 }
 0x190   :  { %v283_v55 = vpop.xlane.xlu2 %282 }
 0x191   :  { %v284_v56 = vadd.f32 1e-08, %v283_v55  ;;  %v273_v57 = vsub.f32 1.5, %v272_v54 }
 0x193   :  { %469 = vrsqrt.f32 %v284_v56  ;;  %v274_v58 = vmul.f32 %v468_v51, %v273_v57  ;;  %vm292_vm7 = vcmp.eq.f32.partialorder %v284_v56, inf  ;;  %v295_v17 = vand.u32 2147483648, %v284_v56 }
 0x194   :  { %vm294_vm8 = vcmp.eq.f32.partialorder %v284_v56, 0.0 }
 0x195   :  { %v275_v59 = vmul.f32 %v274_v58, %v268_v50 }
 0x197   :  { %v277_v63 = vsel %vm276_vm5, %v268_v50, %v275_v59 }
 0x198   :  { %v302_v60 = vpop.permute.xlu2 %301  ;;  %v280_v6 = vsel %vm278_vm6, %v279_v1, %v277_v63 }
 0x199   :  { %v470_v61 = vpop.eup %469  ;;  %v342_v62 = vmul.f32 %v302_v60, %v587_v2  ;;  %v297_v10 = vsub.f32 %v280_v6, %v587_v2 }
 0x19a   :  { %v286_v0 = vmul.f32 %v470_v61, %v284_v56 }
 0x19b   :  { %v343_v3 = vsel %vm315_vm4, %v342_v62, 0.0  ;;  %v298_v15 = vadd.f32 0.2, %v297_v10 }
 0x19c   :  { %v287_v4 = vmul.f32 %v470_v61, %v286_v0  ;;  %v344_v5 = vrot.slane %v343_v3, 4 }
 0x19d   :  { %v299_v21 = vmax.f32 %v298_v15, 0.0 }
 0x19e   :  { %v288_v7 = vmul.f32 0.5, %v287_v4  ;;  %v345_v8 = vadd.f32 %v344_v5, %v343_v3 }
 0x19f   :  { %v304_v25 = vmul.f32 %v302_v60, %v299_v21 }
 0x1a0   :  { %v289_v9 = vsub.f32 1.5, %v288_v7  ;;  %v346_v11 = vrot.slane %v345_v8, 2 }
 0x1a1   :  { %vm309_vm9 = vcmp.gt.f32.partialorder %v304_v25, 0.0 }
 0x1a2   :  { %v290_v12 = vmul.f32 %v470_v61, %v289_v9  ;;  %v347_v13 = vadd.f32 %v346_v11, %v345_v8 }
 0x1a4   :  { %v291_v14 = vmul.f32 %v290_v12, %v284_v56  ;;  %v348_v16 = vrot.slane %v347_v13, 1 }
 0x1a6   :  { %v293_v18 = vsel %vm292_vm7, %v284_v56, %v291_v14  ;;  %v349_v19 = vadd.f32 %v348_v16, %v347_v13 }
 0x1a7   :  { %v296_v20 = vsel %vm294_vm8, %v295_v17, %v293_v18 }
 0x1a8   :  { %v305_v22 = vsub.f32 %v587_v2, %v296_v20  ;;  %351 = vrot.lane.b32.xlu2 %v349_v19, %s557_s2 }
 0x1aa   :  { %v306_v23 = vadd.f32 0.2, %v305_v22 }
 0x1ac   :  { %v307_v24 = vmax.f32 %v306_v23, 0.0 }
 0x1ae   :  { %v308_v26 = vmul.f32 %v307_v24, %v302_v60 }
 0x1b0   :  { %vm310_vm10 = vcmp.gt.f32.partialorder %v308_v26, 0.0  ;;  %v314_v27 = vadd.f32 %v308_v26, %v304_v25 }
 0x1b1   :  { %vm311_vm11 = vmor %vm309_vm9, %vm310_vm10 }
 0x1b2   :  { %v429_v29 = vsel %vm311_vm11, 1.0, %v555_v28  ;;  %v316_v30 = vsel %vm315_vm4, %v314_v27, 0.0 }
 0x1b3   :  { %v317_v31 = vrot.slane %v316_v30, 4  ;;  %v329_v32 = vsel %vm315_vm4, %v429_v29, 0.0 }
 0x1b4   :  { %v330_v33 = vrot.slane %v329_v32, 4 }
 0x1b5   :  { %v318_v34 = vadd.f32 %v317_v31, %v316_v30 }
 0x1b6   :  { %v331_v2 = vadd.f32 %v330_v33, %v329_v32 }
 0x1b7   :  { %v319_v35 = vrot.slane %v318_v34, 2 }
 0x1b8   :  { %v332_v37 = vrot.slane %v331_v2, 2 }
 0x1b9   :  { %v320_v36 = vadd.f32 %v319_v35, %v318_v34 }
 0x1ba   :  { %v333_v40 = vadd.f32 %v332_v37, %v331_v2 }
 0x1bb   :  { %v321_v38 = vrot.slane %v320_v36, 1 }
 0x1bc   :  { %v334_v41 = vrot.slane %v333_v40, 1 }
 0x1bd   :  { %v322_v39 = vadd.f32 %v321_v38, %v320_v36 }
 0x1be   :  { %v335_v42 = vadd.f32 %v334_v41, %v333_v40 }
 0x1bf   :  { %324 = vrot.lane.b32.xlu0 %v322_v39, %s557_s2 }
 0x1c7   :  { %337 = vrot.lane.b32.xlu0 %v335_v42, %s557_s2 }
 0x202   :  { %v352_v28 = vpop.permute.xlu2 %351 }
 0x203   :  { %431 = vst.msk [vmem:[%s615_s3 + $0x2] sm:$0x1] %vm327_vm12, %v352_v28 }
 0x231   :  { %v325_v43 = vpop.permute.xlu0 %324 }
 0x232   :  { %328 = vst.msk [vmem:[%s615_s3] sm:$0x1] %vm327_vm12, %v325_v43 }
 0x239   :  { %v338_v44 = vpop.permute.xlu0 %337 }
 0x23a   :  { %430 = vst.msk [vmem:[%s615_s3 + $0x1] sm:$0x1] %vm327_vm12, %v338_v44 }
 0x23b   :  { %360 = vsyncpa [#allocation3], 1 }
 0x23c   :  { %361 = vsyncpa [#allocation5], 1 }

</bundles_post_ra>
